<compile_context>
chip_gen: v6e
topology: v6e:2x2x1
jax: 0.10.0
libtpu: 0.0.40
codegen_flags: <defaults>
</compile_context>

<pallas_src>
import functools

import jax
import jax.numpy as jnp
from jax import lax
from jax.experimental import pallas as pl
from jax.experimental.pallas import tpu as pltpu


def _downsample_kernel(xb_ref, xh_ref, w_ref, b_ref, o_ref, *, neg_slope):
    """One (batch, row-tile) step of the downsampling conv + LeakyReLU.

    xb_ref: (1, tHo, Ws, Cs)   body rows of the space-to-depth input
    xh_ref: (1, 1,   Ws, Cs)   halo row (first s2d row of the next tile)
    w_ref : (Cout, 4*Cs)       flattened conv weights (2x2 x Cs contraction)
    b_ref : (Cout, 1)          bias
    o_ref : (1, Cout, tHo*Wo)  transposed, lane-dense output tile
    """
    tHo, Ws, Cs = xb_ref.shape[1], xb_ref.shape[2], xb_ref.shape[3]
    Wo = Ws - 1
    cout = w_ref.shape[0]

    # (tHo+1, Ws, Cs): body rows + 1-row halo, concatenated along the major
    # (non-tiled) axis once; every tap below is a slice of this buffer.
    rows = jnp.concatenate([xb_ref[0], xh_ref[0]], axis=0)

    # Four taps of the 2x2 stride-1 conv on the space-to-depth image.  All
    # slices are contiguous on the lane (Cs) axis; the lane-concat builds the
    # im2col patch matrix.  Column order: (kh2, kw2) major, (sh, sw, cin)
    # minor -- must match the weight flattening in the wrapper.
    taps = (rows[0:tHo, 0:Wo, :], rows[0:tHo, 1:Wo + 1, :],
            rows[1:tHo + 1, 0:Wo, :], rows[1:tHo + 1, 1:Wo + 1, :])
    patches = jnp.concatenate(taps, axis=-1).reshape(tHo * Wo, 4 * Cs)

    # Single MXU matmul with f32 accumulation, producing the transposed
    # (Cout, tHo*Wo) result so stores are lane-dense and no NHWC->NCHW
    # transpose is needed afterwards.
    acc = lax.dot_general(
        w_ref[...], patches,
        dimension_numbers=(((1,), (1,)), ((), ())),
        preferred_element_type=jnp.float32)               # (Cout, tHo*Wo)
    acc = acc + b_ref[...]                                # (Cout, 1) broadcast
    out = jnp.where(acc > 0, acc, neg_slope * acc)        # LeakyReLU
    o_ref[...] = out.reshape(1, cout, tHo * Wo).astype(o_ref.dtype)


def _choose_row_tile(Ho, Wo, Ws, Cs, Cout, itemsize=4, budget=8 << 20):
    """Largest divisor of Ho whose tile fits the VMEM budget; prefer tiles
    whose output block stays lane-aligned (tHo*Wo % 128 == 0 or tHo == Ho)."""
    def vmem(t):
        return itemsize * (
            2 * t * Ws * Cs            # double-buffered body block
            + 2 * Ws * Cs              # halo block
            + 2 * Cout * t * Wo        # output block
            + 4 * Cout * Cs + Cout     # weights + bias (resident)
            + 3 * t * Wo * 4 * Cs)     # in-kernel patch matrix / temporaries

    divisors = [t for t in range(Ho, 0, -1) if Ho % t == 0]
    for t in divisors:                 # lane-aligned + fits
        if (t == Ho or (t * Wo) % 128 == 0) and vmem(t) <= budget:
            return t
    for t in divisors:                 # fits (alignment relaxed)
        if vmem(t) <= budget:
            return t
    return divisors[-1]                # smallest divisor as last resort


def downsample_block(x_nchw, weight_oihw, bias, *, factor=2, neg_slope=0.01):
    """Forward pass of DownsampleBlock.

    x_nchw:      (N, C, H, W)       float32 (PyTorch NCHW layout)
    weight_oihw: (Cout, Cin, K, K)  with K = 2*factor (Cout == Cin == C here)
    bias:        (Cout,)
    returns:     (N, Cout, Ho, Wo) with Ho = H//factor, Wo = W//factor
    """
    N, C, H, W = x_nchw.shape
    s = factor
    K = 2 * s
    pad = s // 2
    Ho = (H + 2 * pad - K) // s + 1
    Wo = (W + 2 * pad - K) // s + 1
    Hs, Ws = Ho + 1, Wo + 1            # space-to-depth rows/cols actually read
    Hp, Wp = Hs * s, Ws * s
    Cs = s * s * C                     # space-to-depth channel count

    # ---- glue (layout only): one pad + one transpose pass over the input ----
    # Pad in NCHW, crop to exactly the rows/cols the conv reads, then fold the
    # stride into channels (space-to-depth) while moving channels to the lane
    # axis.  The conv is now a 2x2, stride-1 conv over Cs input channels.
    # TODO(synk): if the surrounding model keeps activations in this s2d/NHWC
    # layout, this prep pass disappears entirely.
    x_p = jnp.pad(x_nchw, ((0, 0), (0, 0),
                           (pad, max(0, Hp - H - pad)),
                           (pad, max(0, Wp - W - pad))))[:, :, :Hp, :Wp]
    x_s2d = (x_p.reshape(N, C, Hs, s, Ws, s)
                .transpose(0, 2, 4, 3, 5, 1)
                .reshape(N, Hs, Ws, Cs))

    # Weights -> (Cout, 2*2*s*s*Cin); column order matches the kernel's patch
    # matrix: ((kh2, kw2), (sh, sw), cin).
    cout, cin = weight_oihw.shape[0], weight_oihw.shape[1]
    w_flat = (weight_oihw.reshape(cout, cin, 2, s, 2, s)
                          .transpose(0, 2, 4, 3, 5, 1)
                          .reshape(cout, 4 * s * s * cin))
    b_col = bias.reshape(cout, 1)

    tHo = _choose_row_tile(Ho, Wo, Ws, Cs, cout)
    grid = (N, Ho // tHo)

    kernel = functools.partial(_downsample_kernel, neg_slope=neg_slope)

    flops = 2 * N * Ho * Wo * K * K * cin * cout
    bytes_accessed = 4 * (int(x_s2d.size) + int(w_flat.size)
                          + int(b_col.size) + N * cout * Ho * Wo)

    out_flat = pl.pallas_call(
        kernel,
        out_shape=jax.ShapeDtypeStruct((N, cout, Ho * Wo), x_nchw.dtype),
        grid_spec=pltpu.PrefetchScalarGridSpec(
            num_scalar_prefetch=0,
            grid=grid,
            in_specs=[
                # body rows of the s2d image (tHo rows starting at i*tHo)
                pl.BlockSpec((1, tHo, Ws, Cs), lambda n, i: (n, i, 0, 0)),
                # 1-row halo: first row of the next tile (always in bounds,
                # the s2d image has Ho + 1 rows)
                pl.BlockSpec((1, 1, Ws, Cs),
                             lambda n, i: (n, (i + 1) * tHo, 0, 0)),
                # weights / bias: constant index map -> resident in VMEM
                pl.BlockSpec((cout, 4 * Cs), lambda n, i: (0, 0)),
                pl.BlockSpec((cout, 1), lambda n, i: (0, 0)),
            ],
            out_specs=pl.BlockSpec((1, cout, tHo * Wo),
                                   lambda n, i: (n, 0, i)),
        ),
        compiler_params=pltpu.CompilerParams(
            dimension_semantics=("parallel", "parallel"),
            vmem_limit_bytes=32 * 1024 * 1024),
        cost_estimate=pl.CostEstimate(flops=flops, transcendentals=0,
                                      bytes_accessed=bytes_accessed),
    )(x_s2d, x_s2d, w_flat, b_col)

    # Free reshape back to NCHW (the kernel already produced channel-major).
    return out_flat.reshape(N, cout, Ho, Wo)


def _reference(x_nchw, weight_oihw, bias, *, factor=2, neg_slope=0.01):
    pad = factor // 2
    y = lax.conv_general_dilated(
        x_nchw, weight_oihw,
        window_strides=(factor, factor),
        padding=[(pad, pad), (pad, pad)],
        dimension_numbers=("NCHW", "OIHW", "NCHW"),
    )
    y = y + bias.reshape(1, -1, 1, 1)
    return jnp.where(y > 0, y, neg_slope * y)


if __name__ == "__main__":
    # Small shapes consistent with the module: batch=2, channels=4, spatial=16.
    N, C, H, W = 2, 4, 16, 16
    factor = 2
    K = 2 * factor

    key = jax.random.PRNGKey(0)
    kx, kw, kb = jax.random.split(key, 3)
    x = jax.random.normal(kx, (N, C, H, W), jnp.float32)
    weight = jax.random.normal(kw, (C, C, K, K), jnp.float32) * 0.1
    bias = jax.random.normal(kb, (C,), jnp.float32) * 0.1

    out = jax.block_until_ready(downsample_block(x, weight, bias, factor=factor))
    ref = jax.block_until_ready(_reference(x, weight, bias, factor=factor))

    assert out.shape == (N, C, H // factor, W // factor), out.shape
    assert jnp.allclose(out, ref, atol=1e-4, rtol=1e-4), float(
        jnp.max(jnp.abs(out - ref)))

    print("KERNEL_OK")
</pallas_src>

<mosaic_0001>
module attributes {stable_mosaic.version = 11 : i64} {
  func.func @_downsample_kernel(%arg0: i32, %arg1: i32, %arg2: memref<1x8x9x16xf32, #tpu.memory_space<vmem>>, %arg3: memref<1x1x9x16xf32, #tpu.memory_space<vmem>>, %arg4: memref<4x64xf32, #tpu.memory_space<vmem>>, %arg5: memref<4x1xf32, #tpu.memory_space<vmem>>, %arg6: memref<1x4x64xf32, #tpu.memory_space<vmem>>) attributes {dimension_semantics = [#tpu.dimension_semantics<parallel>, #tpu.dimension_semantics<parallel>], iteration_bounds = array<i64: 2, 1>, scalar_prefetch = 0 : i64, scratch_operands = 0 : i64, tpu.core_type = #tpu.core_type<tc>, window_params = [{transform_indices = @transform_0, window_bounds = array<i64: 1, 8, 9, 16>}, {transform_indices = @transform_1, window_bounds = array<i64: 1, 1, 9, 16>}, {pipeline_mode = #tpu.pipeline_mode<synchronous>, transform_indices = @transform_2, window_bounds = array<i64: 4, 64>}, {pipeline_mode = #tpu.pipeline_mode<synchronous>, transform_indices = @transform_3, window_bounds = array<i64: 4, 1>}, {transform_indices = @transform_4, window_bounds = array<i64: 1, 4, 64>}]} {
    %c0 = arith.constant 0 : index
    %c0_0 = arith.constant 0 : index
    %c0_1 = arith.constant 0 : index
    %c0_2 = arith.constant 0 : index
    %0 = vector.load %arg2[%c0, %c0_0, %c0_1, %c0_2] : memref<1x8x9x16xf32, #tpu.memory_space<vmem>>, vector<1x8x9x16xf32>
    %1 = vector.shape_cast %0 : vector<1x8x9x16xf32> to vector<8x9x16xf32>
    %c0_3 = arith.constant 0 : index
    %c0_4 = arith.constant 0 : index
    %c0_5 = arith.constant 0 : index
    %c0_6 = arith.constant 0 : index
    %2 = vector.load %arg3[%c0_3, %c0_4, %c0_5, %c0_6] : memref<1x1x9x16xf32, #tpu.memory_space<vmem>>, vector<1x1x9x16xf32>
    %3 = vector.shape_cast %2 : vector<1x1x9x16xf32> to vector<1x9x16xf32>
    %4 = tpu.concatenate %1, %3 in 0 : vector<8x9x16xf32>, vector<1x9x16xf32> -> vector<9x9x16xf32>
    %5 = vector.extract_strided_slice %4 {offsets = [0, 0, 0], sizes = [8, 8, 16], strides = [1, 1, 1]} : vector<9x9x16xf32> to vector<8x8x16xf32>
    %6 = vector.extract_strided_slice %4 {offsets = [0, 1, 0], sizes = [8, 8, 16], strides = [1, 1, 1]} : vector<9x9x16xf32> to vector<8x8x16xf32>
    %7 = vector.extract_strided_slice %4 {offsets = [1, 0, 0], sizes = [8, 8, 16], strides = [1, 1, 1]} : vector<9x9x16xf32> to vector<8x8x16xf32>
    %8 = vector.extract_strided_slice %4 {offsets = [1, 1, 0], sizes = [8, 8, 16], strides = [1, 1, 1]} : vector<9x9x16xf32> to vector<8x8x16xf32>
    %9 = tpu.concatenate %5, %6, %7, %8 in 2 : vector<8x8x16xf32>, vector<8x8x16xf32>, vector<8x8x16xf32>, vector<8x8x16xf32> -> vector<8x8x64xf32>
    %10 = vector.shape_cast %9 : vector<8x8x64xf32> to vector<64x64xf32>
    %c0_7 = arith.constant 0 : index
    %c0_8 = arith.constant 0 : index
    %11 = vector.load %arg4[%c0_7, %c0_8] : memref<4x64xf32, #tpu.memory_space<vmem>>, vector<4x64xf32>
    %cst = arith.constant dense<0.000000e+00> : vector<4x64xf32>
    %12 = tpu.matmul %11, %10, %cst {dimension_numbers = #tpu.dot_dimension_numbers<[1], [1], [0], [0], [0, 0, 1, 0], [], []>} : vector<4x64xf32>, vector<64x64xf32>, vector<4x64xf32> -> vector<4x64xf32>
    %c0_9 = arith.constant 0 : index
    %c0_10 = arith.constant 0 : index
    %13 = vector.load %arg5[%c0_9, %c0_10] : memref<4x1xf32, #tpu.memory_space<vmem>>, vector<4x1xf32>
    %14 = vector.broadcast %13 : vector<4x1xf32> to vector<4x64xf32>
    %15 = arith.addf %12, %14 : vector<4x64xf32>
    %cst_11 = arith.constant 0.000000e+00 : f32
    %16 = vector.broadcast %cst_11 : f32 to vector<4x64xf32>
    %17 = arith.cmpf ogt, %15, %16 : vector<4x64xf32>
    %cst_12 = arith.constant 0.00999999977 : f32
    %18 = vector.broadcast %cst_12 : f32 to vector<4x64xf32>
    %19 = arith.mulf %18, %15 : vector<4x64xf32>
    %20 = arith.select %17, %15, %19 : vector<4x64xi1>, vector<4x64xf32>
    %21 = vector.shape_cast %20 : vector<4x64xf32> to vector<1x4x64xf32>
    %c0_13 = arith.constant 0 : index
    %c0_14 = arith.constant 0 : index
    %c0_15 = arith.constant 0 : index
    %22 = vector.load %arg6[%c0_13, %c0_14, %c0_15] : memref<1x4x64xf32, #tpu.memory_space<vmem>>, vector<1x4x64xf32>
    tpu.vector_store %arg6[%c0_13, %c0_14, %c0_15], %21 {strides = array<i32>} : memref<1x4x64xf32, #tpu.memory_space<vmem>>, vector<1x4x64xf32>,
    return
  }
  func.func @transform_0(%arg0: i32, %arg1: i32) -> (i32, i32, i32, i32) {
    %c0_i32 = arith.constant 0 : i32
    %c0_i32_0 = arith.constant 0 : i32
    %c0_i32_1 = arith.constant 0 : i32
    return %arg0, %arg1, %c0_i32, %c0_i32_0 : i32, i32, i32, i32
  }
  func.func @transform_1(%arg0: i32, %arg1: i32) -> (i32, i32, i32, i32) {
    %c1_i32 = arith.constant 1 : i32
    %0 = arith.addi %arg1, %c1_i32 : i32
    %c8_i32 = arith.constant 8 : i32
    %1 = arith.muli %0, %c8_i32 : i32
    %c0_i32 = arith.constant 0 : i32
    %c0_i32_0 = arith.constant 0 : i32
    %c0_i32_1 = arith.constant 0 : i32
    return %arg0, %1, %c0_i32, %c0_i32_0 : i32, i32, i32, i32
  }
  func.func @transform_2(%arg0: i32, %arg1: i32) -> (i32, i32) {
    %c0_i32 = arith.constant 0 : i32
    %c0_i32_0 = arith.constant 0 : i32
    %c0_i32_1 = arith.constant 0 : i32
    return %c0_i32, %c0_i32_0 : i32, i32
  }
  func.func @transform_3(%arg0: i32, %arg1: i32) -> (i32, i32) {
    %c0_i32 = arith.constant 0 : i32
    %c0_i32_0 = arith.constant 0 : i32
    %c0_i32_1 = arith.constant 0 : i32
    return %c0_i32, %c0_i32_0 : i32, i32
  }
  func.func @transform_4(%arg0: i32, %arg1: i32) -> (i32, i32, i32) {
    %c0_i32 = arith.constant 0 : i32
    %c0_i32_0 = arith.constant 0 : i32
    return %arg0, %c0_i32, %arg1 : i32, i32, i32
  }
}

</mosaic_0001>

<bundles_post_ra>
// kernel: tpu_custom_call.1
= control target key start
LH: loop header
LB: loop body
LE: loop exit
PB: predicated region body
PF: predicated region fallthrough
CT: control target
= control target key end

     0   :  { %9 = vsyncpa [#allocation3], 0  ;;  %s1160_s0 = inlined_call_operand.vmem [shape: f32[2,9,9,16], index: 0, kind: input, shape index: {}]   ;;  %s1161_s1 = inlined_call_operand.vmem [shape: f32[2,9,9,16], index: 1, kind: input, shape index: {}]   ;;  %s1162_s2 = inlined_call_operand.vmem [shape: f32[4,64], index: 2, kind: input, shape index: {}]   ;;  %s1163_s3 = inlined_call_operand.vmem [shape: f32[4,1], index: 3, kind: input, shape index: {}]   ;;  %s1164_s4 = inlined_call_operand.hbm [shape: f32[2,4,64], index: 4, kind: output, shape index: {}]  }
   0x1   :  { %11 = vsyncpa [#allocation3 + $0x1], 0  ;;  %s914_s15 = smov 0   ;;  %s916_s16 = smov 0  }
   0x2   :  { %s918_s17 = smov 0   ;;  %s920_s18 = smov 0  }
   0x3   :  { %s922_s19 = smov 0   ;;  %s924_s20 = smov 0  }
   0x4 LB: > { %s688_s21 = sadd.s32 4294967295, %s880_s20   ;;  %s689_s22 = sadd.s32 4294967294, %s880_s20   ;;  %s880_s20 = sphi %s924_s20, %s17_s20   ;;  %s876_s19 = sphi %s922_s19, %s1171_s19   ;;  %s872_s18 = sphi %s920_s18, %s1170_s18   ;;  %s868_s17 = sphi %s918_s17, %s1169_s17   ;;  %s864_s16 = sphi %s916_s16, %s1168_s16   ;;  %s860_s15 = sphi %s914_s15, %s1167_s15  }
   0x5   : > { %s29_s23 = sadd.s32 1, %s876_s19  ;;  %s140_s24 = sadd.s32 1, %s868_s17 }
   0x6   : > { %p31_p0 = scmp.ge.s32.totalorder %s29_s23, 2  ;;  %p150_p1 = scmp.ne.s32.totalorder %s868_s17, %s864_s16 }
   0x7   : > { %p151_p2 = scmp.eq.s32.totalorder %s688_s21, 1  ;;  %p156_p3 = scmp.ne.s32.totalorder %s864_s16, %s860_s15 }
   0x8   : > { %s1173_s23 = smov (%p31_p0, %s29_s23), 0  ;;  %p157_p5 = scmp.eq.s32.totalorder %s689_s22, 1 }
   0x9   : > { %p954_p4 = por %p151_p2, %p150_p1  ;;  %s135_s26 = ssub.s32 %s876_s19, %s1173_s23 }
   0xa   : > { %p692_p6 = scmp.ge.s32.totalorder %s880_s20, 1  ;;  %p138_p7 = scmp.eq.s32.totalorder %s135_s26, 0 }
   0xb   : > { %p961_p8 = por %p157_p5, %p156_p3  ;;  %p221_p9 = scmp.lt.s32.totalorder %s880_s20, 3 }
   0xc   : > { %s967_s28 = scalar_select %p138_p7, %s868_s17, %s140_s24  }
   0xd   : > { %p222_p10 = pnand %p692_p6, %p221_p9 }
   0xe   : > { %p274_p11 = scmp.lt.s32.totalorder (!%p222_p10), %s872_s18, 1  ;;  %s882_s12 = smov (!%p222_p10), 32  }
   0xf   : > { %225 = sbr.rel (%p222_p10) target bundleno = 403 (0x193), region = 36  ;;  %s883_s13 = smov (!%p222_p10), 16  }
  0x10   : > { %s884_s14 = smov (!%p222_p10), 48   ;;  %s706_s5 = sshll.u32 (!%p222_p10), %s872_s18, 6 }
  0x11   : > { %s1120_s10 = scalar_lea.hbm (!%p222_p10), %s1164_s4, %s706_s5 }
  0x14   : > { %s275_s29 = scalar_select %p274_p11, %s872_s18, 1  ;;  %vm336_vm0 = vcmask 1046528   ;;  %v885_v18 = vmov 0.0   ;;  %vm886_vm1 = vmmov 0   ;;  %v887_v45 = vmov 0  }
  0x15   : > { %720 = vmatprep.subr.mxu0 %v885_v18  ;;  %736 = vmatprep.mubr.msk.f32.mxu0 %vm886_vm1, %v885_v18  ;;  %v466_v47 = vld [vmem:[%s1163_s3] sm:$0xf]  ;;  %vm438_vm2 = vcmask 130048   ;;  %vm447_vm3 = vcmask 261120   ;;  %vm472_vm4 = vcmask 523264   ;;  %vm456_vm5 = vcmask 392192  }
  0x16   : > { %s739_s30 = smul.u32 144, %s275_s29  ;;  %803 = vset.pattern.permute.xlu0 %v887_v45  ;;  %s265_s29 = sand.u32 1, %s864_s16   ;;  %vm573_vm7 = vcmask 519168  }
  0x17   : > { %s888_s18 = smov [#allocation2]  }
  0x18   : > { %s974_s7 = scalar_lea.vmem %s1160_s0, %s739_s30  ;;  %s710_s8 = sadd.s32 128, %s739_s30 }
  0x19   : > { %v977_v0 = vld [vmem:[%s974_s7 + $0x70] sm:$0xff]  ;;  %v980_v1 = vld [vmem:[%s974_s7 + $0x60] sm:$0xff]  ;;  %v315_v2 = vld [vmem:[%s974_s7 + $0x68] sm:$0x1]  ;;  %s299_s11 = scalar_lea.vmem %s1161_s1, %s710_s8  ;;  %s693_s30 = sshll.u32 %s265_s29, 2 }
  0x1a   : > { %398 = vrot.lane.b32.xlu0 %v977_v0, %s882_s12  ;;  %v358_v3 = vrot.slane %v977_v0, 1  ;;  %v355_v4 = vrot.slane %v980_v1, 1  ;;  %v356_v5 = vrot.slane %v315_v2, 1  ;;  %v318_v6 = vld [vmem:[%s299_s11] sm:$0xff]  ;;  %v317_v7 = vld [vmem:[%s974_s7 + $0x78] sm:$0x1] }
  0x1b   : > { %v359_v9 = vrot.slane %v317_v7, 1  ;;  %v993_v10 = vld [vmem:[%s974_s7 + $0x50] sm:$0xff]  ;;  %v313_v11 = vld [vmem:[%s974_s7 + $0x58] sm:$0x1]  ;;  %v319_v13 = vld [vmem:[%s299_s11 + $0x8] sm:$0x1] }
  0x1c   : > { %v357_v8 = vsel %vm336_vm0, %v355_v4, %v356_v5  ;;  %v352_v14 = vrot.slane %v993_v10, 1  ;;  %v353_v15 = vrot.slane %v313_v11, 1  ;;  %v411_v16 = vrot.slane %v318_v6, 1  ;;  %v1005_v20 = vld [vmem:[%s974_s7 + $0x40] sm:$0xff]  ;;  %v311_v21 = vld [vmem:[%s974_s7 + $0x48] sm:$0x1] }
  0x1d   : > { %373 = vrot.lane.b32.xlu1 %v357_v8, %s883_s13  ;;  %v360_v12 = vsel %vm336_vm0, %v358_v3, %v359_v9  ;;  %v412_v17 = vrot.slane %v319_v13, 1  ;;  %v349_v23 = vrot.slane %v1005_v20, 1  ;;  %v350_v24 = vrot.slane %v311_v21, 1  ;;  %v1014_v25 = vld [vmem:[%s974_s7 + $0x30] sm:$0xff]  ;;  %v309_v26 = vld [vmem:[%s974_s7 + $0x38] sm:$0x1] }
  0x1e   : > { %400 = vrot.lane.b32.xlu0 %v318_v6, %s882_s12  ;;  %v354_v19 = vsel %vm336_vm0, %v352_v14, %v353_v15  ;;  %v346_v28 = vrot.slane %v1014_v25, 1  ;;  %v347_v29 = vrot.slane %v309_v26, 1  ;;  %v1026_v31 = vld [vmem:[%s974_s7 + $0x20] sm:$0xff]  ;;  %v307_v32 = vld [vmem:[%s974_s7 + $0x28] sm:$0x1]  ;;  %v1033_v35 = vld [vmem:[%s974_s7 + $0x10] sm:$0xff] }
  0x1f   : > { %v413_v22 = vsel %vm336_vm0, %v411_v16, %v412_v17  ;;  %v351_v27 = vsel %vm336_vm0, %v349_v23, %v350_v24  ;;  %v343_v33 = vrot.slane %v1026_v31, 1  ;;  %v344_v34 = vrot.slane %v307_v32, 1  ;;  %v305_v36 = vld [vmem:[%s974_s7 + $0x18] sm:$0x1]  ;;  %v1046_v41 = vld [vmem:[%s974_s7] sm:$0xff]  ;;  %s267_s6 = scalar_lea.vmem [#allocation2], %s693_s30 }
  0x20   : > { %v348_v30 = vsel %vm336_vm0, %v346_v28, %v347_v29  ;;  %v340_v38 = vrot.slane %v1033_v35, 1  ;;  %v341_v39 = vrot.slane %v305_v36, 1  ;;  %v303_v42 = vld [vmem:[%s974_s7 + $0x8] sm:$0x1]  ;;  %v337_v43 = vrot.slane %v1046_v41, 1  ;;  %s590_s7 = sshll.u32 %s267_s6, 4  ;;  %s591_s7 = int_to_ptr.vmem [resolvable:$true] %s590_s7 }
  0x21   : > { %426 = vrot.lane.b32.xlu1 %v360_v12, %s884_s14  ;;  %v345_v37 = vsel %vm336_vm0, %v343_v33, %v344_v34  ;;  %v338_v44 = vrot.slane %v303_v42, 1  ;;  %v465_v33 = vld [vmem:[%s1162_s2] sm:$0xf]  ;;  %s576_s11 = scalar_lea.sflag [#allocation3], %s265_s29 }
  0x22   : > { %375 = vrot.lane.b32.xlu0 %v360_v12, %s883_s13  ;;  %v342_v40 = vsel %vm336_vm0, %v340_v38, %v341_v39 }
  0x23   : > { %v339_v46 = vsel %vm336_vm0, %v337_v43, %v338_v44 }
  0x25   : > { %396 = vrot.lane.b32.xlu1 %v980_v1, %s882_s12 }
  0x26   : > { %371 = vrot.lane.b32.xlu0 %v354_v19, %s883_s13 }
  0x29   : > { %428 = vrot.lane.b32.xlu1 %v413_v22, %s884_s14 }
  0x2a   : > { %424 = vrot.lane.b32.xlu0 %v357_v8, %s884_s14 }
  0x2d   : > { %369 = vrot.lane.b32.xlu1 %v351_v27, %s883_s13 }
  0x2e   : > { %394 = vrot.lane.b32.xlu0 %v993_v10, %s882_s12 }
  0x31   : > { %422 = vrot.lane.b32.xlu1 %v354_v19, %s884_s14 }
  0x32   : > { %367 = vrot.lane.b32.xlu0 %v348_v30, %s883_s13 }
  0x35   : > { %392 = vrot.lane.b32.xlu1 %v1005_v20, %s882_s12 }
  0x36   : > { %420 = vrot.lane.b32.xlu0 %v351_v27, %s884_s14 }
  0x39   : > { %365 = vrot.lane.b32.xlu1 %v345_v37, %s883_s13 }
  0x3a   : > { %390 = vrot.lane.b32.xlu0 %v1014_v25, %s882_s12 }
  0x3d   : > { %418 = vrot.lane.b32.xlu1 %v348_v30, %s884_s14 }
  0x3e   : > { %363 = vrot.lane.b32.xlu0 %v342_v40, %s883_s13 }
  0x41   : > { %388 = vrot.lane.b32.xlu1 %v1026_v31, %s882_s12 }
  0x42   : > { %416 = vrot.lane.b32.xlu0 %v345_v37, %s884_s14 }
  0x45   : > { %361 = vrot.lane.b32.xlu1 %v339_v46, %s883_s13  ;;  %s808_s13 = sshll.u32 %s888_s18, 4  ;;  %s809_s13 = int_to_ptr.vmem [resolvable:$false] %s808_s13 }
  0x46   : > { %386 = vrot.lane.b32.xlu0 %v1033_v35, %s882_s12  ;;  %s804_s12 = scalar_lea.vmem %s591_s7, 64  ;;  %p811_p1 = scmp.lt.s32.totalorder %s591_s7, %s809_s13 }
  0x47   : > { %p805_p12 = scmp.ne.s32.totalorder %s591_s7, %s804_s12 }
  0x49   : > { %414 = vrot.lane.b32.xlu1 %v342_v40, %s884_s14  ;;  %p806_p13 = pnand %p805_p12, %p954_p4  ;;  %s810_s14 = scalar_lea.vmem %s809_s13, 128 }
  0x4a   : > { %469 = vperm.xlu0 %803, %v466_v47   ;;  %p812_p2 = scmp.lt.s32.totalorder %s810_s14, %s804_s12 }
  0x4b   : > { %p807_p0 = pneg %p806_p13 }
  0x4c   : > { %p813_p3 = por %p812_p2, %p811_p1 }
  0x4e   : > { %p814_p5 = pnand %p813_p3, %p807_p0 }
  0x8c   : > { %v399_v48 = vpop.permute.xlu0 %398 }
  0x8f   : > { %v374_v49 = vpop.permute.xlu1 %373 }
  0x90   : > { %v401_v50 = vpop.permute.xlu0 %400  ;;  %v445_v58 = vsel %vm438_vm2, %v980_v1, %v374_v49 }
  0x91   : > { %v454_v61 = vsel %vm447_vm3, %v445_v58, %v399_v48 }
  0x93   : > { %v427_v51 = vpop.permute.xlu1 %426 }
  0x94   : > { %v376_v52 = vpop.permute.xlu0 %375  ;;  %v463_v63 = vsel %vm456_vm5, %v454_v61, %v427_v51 }
  0x95   : > { %v446_v54 = vsel %vm438_vm2, %v977_v0, %v376_v52 }
  0x96   : > { %v455_v57 = vsel %vm447_vm3, %v446_v54, %v401_v50 }
  0x97   : > { %v397_v53 = vpop.permute.xlu1 %396 }
  0x98   : > { %v372_v55 = vpop.permute.xlu0 %371 }
  0x99   : > { %v444_v0 = vsel %vm438_vm2, %v993_v10, %v372_v55 }
  0x9a   : > { %v453_v1 = vsel %vm447_vm3, %v444_v0, %v397_v53 }
  0x9b   : > { %v429_v56 = vpop.permute.xlu1 %428 }
  0x9c   : > { %v425_v59 = vpop.permute.xlu0 %424  ;;  %v464_v60 = vsel %vm456_vm5, %v455_v57, %v429_v56 }
  0x9d   : > { %721 = vmatpush3.xpose.msk.msra.mxu0 %vm472_vm4, %v464_v60  ;;  %v462_v4 = vsel %vm456_vm5, %v453_v1, %v425_v59 }
  0x9e   : > { %722 = vmatprep.subr.mxu0 %v885_v18 }
  0x9f   : > { %v370_v62 = vpop.permute.xlu1 %369 }
  0xa0   : > { %v395_v2 = vpop.permute.xlu0 %394  ;;  %v443_v5 = vsel %vm438_vm2, %v1005_v20, %v370_v62 }
  0xa1   : > { %723 = vmatpush3.xpose.msk.msra.mxu0 %vm472_vm4, %v463_v63  ;;  %v452_v8 = vsel %vm447_vm3, %v443_v5, %v395_v2 }
  0xa2   : > { %724 = vmatprep.subr.mxu0 %v885_v18 }
  0xa3   : > { %v423_v3 = vpop.permute.xlu1 %422 }
  0xa4   : > { %v368_v6 = vpop.permute.xlu0 %367  ;;  %v461_v10 = vsel %vm456_vm5, %v452_v8, %v423_v3 }
  0xa5   : > { %725 = vmatpush3.xpose.msk.msra.mxu0 %vm472_vm4, %v462_v4  ;;  %v442_v7 = vsel %vm438_vm2, %v1014_v25, %v368_v6 }
  0xa6   : > { %726 = vmatprep.subr.mxu0 %v885_v18 }
  0xa7   : > { %v393_v9 = vpop.permute.xlu1 %392 }
  0xa8   : > { %v421_v11 = vpop.permute.xlu0 %420  ;;  %v451_v12 = vsel %vm447_vm3, %v442_v7, %v393_v9 }
  0xa9   : > { %727 = vmatpush3.xpose.msk.msra.mxu0 %vm472_vm4, %v461_v10  ;;  %v460_v14 = vsel %vm456_vm5, %v451_v12, %v421_v11 }
  0xaa   : > { %728 = vmatprep.subr.mxu0 %v885_v18 }
  0xab   : > { %v366_v13 = vpop.permute.xlu1 %365 }
  0xac   : > { %v441_v15 = vsel %vm438_vm2, %v1026_v31, %v366_v13  ;;  %v391_v16 = vpop.permute.xlu0 %390 }
  0xad   : > { %729 = vmatpush3.xpose.msk.msra.mxu0 %vm472_vm4, %v460_v14  ;;  %v450_v17 = vsel %vm447_vm3, %v441_v15, %v391_v16 }
  0xae   : > { %730 = vmatprep.subr.mxu0 %v885_v18 }
  0xaf   : > { %v419_v19 = vpop.permute.xlu1 %418 }
  0xb0   : > { %v459_v20 = vsel %vm456_vm5, %v450_v17, %v419_v19  ;;  %v364_v21 = vpop.permute.xlu0 %363 }
  0xb1   : > { %v440_v22 = vsel %vm438_vm2, %v1033_v35, %v364_v21  ;;  %731 = vmatpush3.xpose.msk.msra.mxu0 %vm472_vm4, %v459_v20 }
  0xb2   : > { %732 = vmatprep.subr.mxu0 %v885_v18 }
  0xb3   : > { %v389_v23 = vpop.permute.xlu1 %388 }
  0xb4   : > { %v449_v24 = vsel %vm447_vm3, %v440_v22, %v389_v23  ;;  %v417_v25 = vpop.permute.xlu0 %416 }
  0xb5   : > { %v458_v26 = vsel %vm456_vm5, %v449_v24, %v417_v25 }
  0xb6   : > { %733 = vmatpush3.xpose.msk.msra.mxu0 %vm472_vm4, %v458_v26 }
  0xb7   : > { %v362_v27 = vpop.permute.xlu1 %361  ;;  %734 = vmatprep.subr.mxu0 %v885_v18 }
  0xb8   : > { %v439_v28 = vsel %vm438_vm2, %v1046_v41, %v362_v27  ;;  %v387_v29 = vpop.permute.xlu0 %386 }
  0xb9   : > { %v448_v30 = vsel %vm447_vm3, %v439_v28, %v387_v29 }
  0xbb   : > { %v415_v31 = vpop.permute.xlu1 %414 }
  0xbc   : > { %v457_v32 = vsel %vm456_vm5, %v448_v30, %v415_v31 }
  0xbd   : > { %735 = vmatpush3.xpose.msk.msra.mxu0 %vm472_vm4, %v457_v32 }
  0xc0   : > { %737 = vmatmul.mubr.msk.f32.vlgmr.msra.gmra.mxu0 %vm472_vm4, %v465_v33 }
  0xc5   : > { %v470_v18 = vpop.permute.xlu0 %469 }
 0x180   : > { %v566_v34 = vpop.f32.mrf.mxu0 }
 0x181   : > { %v567_v35 = vadd.f32 %v566_v34, %v470_v18 }
 0x182   : > { %v738_v36 = vpop.f32.mrf.mxu0 }
 0x183   : > { %vm570_vm6 = vcmp.gt.f32.partialorder %v567_v35, 0.0  ;;  %v571_v37 = vmul.f32 0.01, %v567_v35 }
 0x185   : > { %v572_v38 = vsel %vm570_vm6, %v567_v35, %v571_v37 }
 0x186   : > { %574 = vst.msk [vmem:[%s267_s6] sm:$0xf] %vm573_vm7, %v572_v38 }
 0x187   : > { %817 = shalt.err (!%p814_p5)
}
 0x188   : > { %s818_s21 = scalar_lea.hbm %s1120_s10, 64  ;;  %s822_s26 = scalar_lea.hbm %s1164_s4, 128 }
 0x189   : > { %p819_p6 = scmp.ne.s32.totalorder %s1120_s10, %s818_s21  ;;  %p823_p10 = scmp.lt.s32.totalorder %s1120_s10, %s1164_s4 }
 0x18a   : > { %p824_p11 = scmp.lt.s32.totalorder %s822_s26, %s818_s21 }
 0x18b   : > { %p820_p7 = pnand %p819_p6, %p954_p4 }
 0x18c   : > { %p825_p12 = por %p824_p11, %p823_p10 }
 0x18d   : > { %p821_p9 = pneg %p820_p7 }
 0x18f   : > { %p826_p13 = pnand %p825_p12, %p821_p9 }
 0x191   : > { %829 = shalt.err (!%p826_p13)
}
 0x192   : > { %741 = dma.vmem_to_hbm [thread:$0]  (%p954_p4), %s591_s7, 64, %s1120_s10, %s576_s11  }
 0x193 PF: > { %p748_p0 = scmp.ge.s32.totalorder %s880_s20, 2  ;;  %s602_s5 = sand.u32 1, %s860_s15  }
 0x194   : > { %s603_s6 = scalar_lea.sflag [#allocation3], %s602_s5 }
 0x195   : > { %p744_p1 = pnand %p748_p0, %p961_p8 }
 0x197   : > { %p745_p2 = pneg %p744_p1 }
 0x199   : > { %855 = dma.done.wait (%p745_p2), %s603_s6, 64  }
 0x19a   : > { %857 = vsyncadd (%p745_p2), %s603_s6, 4294967232  ;;  %s17_s20 = sadd.s32 1, %s880_s20   ;;  %s1167_s15 = smov %s864_s16 }
 0x19b   : > { %p14_p3 = scmp.ge.s32.totalorder %s17_s20, 4   ;;  %s1168_s16 = smov %s868_s17 }
 0x19c   : > { %s1169_s17 = smov %s967_s28  ;;  %s1170_s18 = smov %s876_s19 }
 0x19d   : > { %s1171_s19 = smov %s1173_s23  ;;  %16 = sbr.rel (!%p14_p3) target bundleno = 4 (0x4), region = 74 }
 0x1a2   :  { %608 = vsyncpa [#allocation3], 1 }
 0x1a3   :  { %610 = vsyncpa [#allocation3 + $0x1], 1 }

</bundles_post_ra>
